<compile_context>
chip_gen: v7x
topology: tpu7x:2x2x1
jax: 0.10.0
libtpu: 0.0.40
codegen_flags: <defaults>
</compile_context>

<pallas_src>
import jax
import jax.numpy as jnp
from jax.experimental import pallas as pl
from jax.experimental.pallas import tpu as pltpu


def _tempswish_kernel(beta_ref, x_ref, o_ref):
    # beta_ref : SMEM (1,) f32 scalar (scalar-prefetch operand)
    # x_ref    : VMEM (TM, LANE) tile
    # o_ref    : VMEM (TM, LANE) tile
    beta = beta_ref[0]
    x = x_ref[...].astype(jnp.float32)
    z = beta * x
    # Exact, numerically stable sigmoid with a single EUP transcendental:
    #   sigmoid(z) = 0.5 * tanh(0.5 * z) + 0.5
    sig = 0.5 * jnp.tanh(0.5 * z) + 0.5
    o_ref[...] = (x * sig).astype(o_ref.dtype)


def _round_up(a, b):
    return ((a + b - 1) // b) * b


def tempswish(x, beta, *, target_block_bytes=4 << 20):
    """x: any-shape float tensor (e.g. NCHW). beta: scalar float32 parameter."""
    orig_shape = x.shape
    orig_dtype = x.dtype
    total = x.size
    if total == 0:
        return x

    xf = x.reshape(-1)

    # Pick a lane width (multiple of 128) that divides total exactly so no
    # padding pass is needed.
    lane = None
    for cand in (1024, 512, 256, 128):
        if total % cand == 0:
            lane = cand
            break
    padded = total
    if lane is None:
        # TODO(synk): pad+slice costs an extra HBM round trip; only hit when
        # x.size is not a multiple of 128.
        lane = 128
        padded = pl.cdiv(total, lane) * lane
        xf = jnp.pad(xf, (0, padded - total))

    m_rows = padded // lane
    x2d = xf.reshape(m_rows, lane)

    # Row-tile size: ~target_block_bytes per block, multiple of 16 sublanes
    # (legal for both f32 and bf16 tiles).
    sub = 16
    elem_bytes = jnp.dtype(orig_dtype).itemsize
    tm_cap = max(sub, (target_block_bytes // (lane * elem_bytes)) // sub * sub)
    if m_rows <= tm_cap:
        if m_rows >= 2 * sub:
            # Split into >=2 row tiles so both v7x TensorCores get work.
            tm = _round_up(pl.cdiv(m_rows, 2), sub)
        else:
            tm = m_rows  # full-extent block (always legal)
    else:
        tm = tm_cap
    grid = (pl.cdiv(m_rows, tm),)

    beta_arr = jnp.asarray(beta, jnp.float32).reshape(1)

    out2d = pl.pallas_call(
        _tempswish_kernel,
        out_shape=jax.ShapeDtypeStruct(x2d.shape, orig_dtype),
        grid_spec=pltpu.PrefetchScalarGridSpec(
            num_scalar_prefetch=1,          # beta -> SMEM scalar
            grid=grid,
            in_specs=[pl.BlockSpec((tm, lane), lambda i, beta: (i, 0))],
            out_specs=pl.BlockSpec((tm, lane), lambda i, beta: (i, 0)),
        ),
        compiler_params=pltpu.CompilerParams(
            dimension_semantics=("parallel",),
            vmem_limit_bytes=48 << 20,
        ),
    )(beta_arr, x2d)

    out_flat = out2d.reshape(-1)
    if padded != total:
        out_flat = out_flat[:total]
    return out_flat.reshape(orig_shape)


if __name__ == "__main__":
    key = jax.random.PRNGKey(0)

    # Small NCHW input consistent with the module's elementwise forward.
    x = jax.random.normal(key, (2, 4, 16, 16), dtype=jnp.float32)

    # beta init matches nn.Parameter(torch.as_tensor(0.)); also test nonzero
    # beta to exercise the sigmoid(beta * x) path.
    for beta_val in (0.0, 1.3):
        beta = jnp.float32(beta_val)
        y = jax.block_until_ready(tempswish(x, beta))
        y_ref = x * jax.nn.sigmoid(beta * x)
        assert y.shape == x.shape and y.dtype == x.dtype
        assert jnp.allclose(y, y_ref, atol=1e-5, rtol=1e-5), (
            f"mismatch for beta={beta_val}")

    # Ragged size (not a multiple of 128) exercises the pad fallback path.
    xr = jax.random.normal(jax.random.PRNGKey(1), (3, 5, 7, 11), dtype=jnp.float32)
    yr = jax.block_until_ready(tempswish(xr, jnp.float32(0.7)))
    yr_ref = xr * jax.nn.sigmoid(0.7 * xr)
    assert jnp.allclose(yr, yr_ref, atol=1e-5, rtol=1e-5), "mismatch (ragged)"

    # bf16 path: compute in f32 in-kernel, store bf16.
    xb = x.astype(jnp.bfloat16)
    yb = jax.block_until_ready(tempswish(xb, jnp.float32(1.3)))
    yb_ref = (xb.astype(jnp.float32)
              * jax.nn.sigmoid(1.3 * xb.astype(jnp.float32))).astype(jnp.bfloat16)
    assert yb.dtype == jnp.bfloat16
    assert jnp.allclose(yb.astype(jnp.float32), yb_ref.astype(jnp.float32),
                        atol=2e-2, rtol=2e-2), "mismatch (bf16)"

    print("KERNEL_OK")
</pallas_src>

<mosaic_0001>
module attributes {stable_mosaic.version = 11 : i64} {
  func.func @_tempswish_kernel(%arg0: i32, %arg1: memref<1xf32, #tpu.memory_space<smem>>, %arg2: memref<2x1024xf32, #tpu.memory_space<vmem>>, %arg3: memref<2x1024xf32, #tpu.memory_space<vmem>>) attributes {dimension_semantics = [#tpu.dimension_semantics<parallel>], iteration_bounds = array<i64: 1>, scalar_prefetch = 1 : i64, scratch_operands = 0 : i64, tpu.core_type = #tpu.core_type<tc>, window_params = [{transform_indices = @transform_0, window_bounds = array<i64: 2, 1024>}, {transform_indices = @transform_1, window_bounds = array<i64: 2, 1024>}]} {
    %c0 = arith.constant 0 : index
    %0 = memref.load %arg1[%c0] : memref<1xf32, #tpu.memory_space<smem>>
    %c0_0 = arith.constant 0 : index
    %c0_1 = arith.constant 0 : index
    %1 = vector.load %arg2[%c0_0, %c0_1] : memref<2x1024xf32, #tpu.memory_space<vmem>>, vector<2x1024xf32>
    %2 = vector.broadcast %0 : f32 to vector<2x1024xf32>
    %3 = arith.mulf %2, %1 : vector<2x1024xf32>
    %cst = arith.constant 5.000000e-01 : f32
    %4 = vector.broadcast %cst : f32 to vector<2x1024xf32>
    %5 = arith.mulf %4, %3 : vector<2x1024xf32>
    %6 = math.tanh %5 : vector<2x1024xf32>
    %cst_2 = arith.constant 5.000000e-01 : f32
    %7 = vector.broadcast %cst_2 : f32 to vector<2x1024xf32>
    %8 = arith.mulf %7, %6 : vector<2x1024xf32>
    %cst_3 = arith.constant 5.000000e-01 : f32
    %9 = vector.broadcast %cst_3 : f32 to vector<2x1024xf32>
    %10 = arith.addf %8, %9 : vector<2x1024xf32>
    %11 = arith.mulf %1, %10 : vector<2x1024xf32>
    %c0_4 = arith.constant 0 : index
    %c0_5 = arith.constant 0 : index
    %12 = vector.load %arg3[%c0_4, %c0_5] : memref<2x1024xf32, #tpu.memory_space<vmem>>, vector<2x1024xf32>
    tpu.vector_store %arg3[%c0_4, %c0_5], %11 {strides = array<i32>} : memref<2x1024xf32, #tpu.memory_space<vmem>>, vector<2x1024xf32>,
    return
  }
  func.func @transform_0(%arg0: i32, %arg1: memref<1xf32, #tpu.memory_space<smem>>) -> (i32, i32) {
    %c0_i32 = arith.constant 0 : i32
    %c0_i32_0 = arith.constant 0 : i32
    return %arg0, %c0_i32 : i32, i32
  }
  func.func @transform_1(%arg0: i32, %arg1: memref<1xf32, #tpu.memory_space<smem>>) -> (i32, i32) {
    %c0_i32 = arith.constant 0 : i32
    %c0_i32_0 = arith.constant 0 : i32
    return %arg0, %c0_i32 : i32, i32
  }
}

</mosaic_0001>

<bundles_post_ra>
// kernel: tpu_custom_call.1
= control target key start
LH: loop header
LB: loop body
LE: loop exit
PB: predicated region body
PF: predicated region fallthrough
CT: control target
= control target key end

     0   :  { %8 = vsyncpa [#allocation5], 0  ;;  %s154_s0 = inlined_call_operand.<no memory space> [shape: f32[1], index: 0, kind: input, shape index: {}]   ;;  %s155_s1 = inlined_call_operand.hbm [shape: f32[2,1024], index: 1, kind: input, shape index: {}]   ;;  %s156_s2 = inlined_call_operand.hbm [shape: f32[2,1024], index: 2, kind: output, shape index: {}]  }
   0x1   :  { %9 = vsyncpa [#allocation6], 0  ;;  %s110_s9 = smov [#allocation4]   ;;  %s62_s13 = scalar_lea.hbm %s155_s1, 256 }
   0x2   :  { %s16_s10 = sshll.u32 %s110_s9, 4  ;;  %p63_p0 = scmp.ne.s32.totalorder %s155_s1, %s62_s13  ;;  %s17_s10 = int_to_ptr.vmem [resolvable:$true] %s16_s10 }
   0x3   :  { %p66_p1 = scmp.lt.u32.totalorder %s62_s13, %s155_s1 }
   0x5   :  { %p68_p2 = pnand %p66_p1, %p63_p0 }
   0x7   :  { %71 = shalt.err (!%p68_p2)
}
   0x8   :  { %s72_s18 = scalar_lea.vmem %s17_s10, 256  ;;  %p77_p4 = scmp.lt.s32.totalorder %s17_s10, %s17_s10 }
   0x9   :  { %p73_p3 = scmp.ne.s32.totalorder %s17_s10, %s72_s18  ;;  %p78_p5 = scmp.lt.s32.totalorder %s72_s18, %s72_s18 }
   0xb   :  { %p79_p6 = por %p78_p5, %p77_p4 }
   0xd   :  { %p80_p7 = pnand %p79_p6, %p73_p3 }
   0xf   :  { %83 = shalt.err (!%p80_p7)
}
  0x10   :  { %19 = dma.hbm_to_vmem [thread:$0]  %s155_s1, 256, %s17_s10, [#allocation5]  }
  0x11   :  { %106 = dma.done.wait [#allocation5], 256  }
  0x12   :  { %107 = vsyncadd [#allocation5], 4294967040  ;;  %v26_v0 = vstv %s154_s0  ;;  %v24_v1 = vld [vmem:[#allocation4] sm:$0xff]  ;;  %v25_v2 = vld [vmem:[#allocation4 + $0x8] sm:$0xff]  ;;  %s111_s1 = smov [#allocation7]  }
  0x13   :  { %v27_v3 = vmul.f32 %v26_v0, %v24_v1  ;;  %v28_v4 = vmul.f32 %v26_v0, %v25_v2  ;;  %s47_s23 = sshll.u32 %s111_s1, 4  ;;  %s48_s23 = int_to_ptr.vmem [resolvable:$true] %s47_s23 }
  0x14   :  { %s84_s0 = scalar_lea.vmem %s48_s23, 256  ;;  %p89_p9 = scmp.lt.s32.totalorder %s48_s23, %s48_s23 }
  0x15   :  { %v29_v5 = vmul.f32 0.5, %v27_v3  ;;  %v30_v6 = vmul.f32 0.5, %v28_v4  ;;  %p85_p8 = scmp.ne.s32.totalorder %s48_s23, %s84_s0  ;;  %p90_p10 = scmp.lt.s32.totalorder %s84_s0, %s84_s0 }
  0x17   :  { %58 = vtanh.f32 %v29_v5  ;;  %p91_p11 = por %p90_p10, %p89_p9 }
  0x18   :  { %60 = vtanh.f32 %v30_v6 }
  0x19   :  { %p92_p12 = pnand %p91_p11, %p85_p8 }
  0x21   :  { %v59_v7 = vpop.eup %58 }
  0x22   :  { %v61_v8 = vpop.eup %60  ;;  %v33_v9 = vmul.f32 0.5, %v59_v7 }
  0x23   :  { %v34_v10 = vmul.f32 0.5, %v61_v8 }
  0x24   :  { %v35_v11 = vadd.f32 0.5, %v33_v9 }
  0x25   :  { %v36_v12 = vadd.f32 0.5, %v34_v10 }
  0x26   :  { %v37_v13 = vmul.f32 %v35_v11, %v24_v1 }
  0x27   :  { %v38_v14 = vmul.f32 %v36_v12, %v25_v2 }
  0x28   :  { %39 = vst [vmem:[#allocation7] sm:$0xff] %v37_v13 }
  0x29   :  { %40 = vst [vmem:[#allocation7 + $0x8] sm:$0xff] %v38_v14 }
  0x2a   :  { %95 = shalt.err (!%p92_p12)
}
  0x2b   :  { %s96_s26 = scalar_lea.hbm %s156_s2, 256 }
  0x2c   :  { %p97_p13 = scmp.ne.s32.totalorder %s156_s2, %s96_s26  ;;  %p100_p0 = scmp.lt.u32.totalorder %s96_s26, %s156_s2 }
  0x2e   :  { %p102_p1 = pnand %p100_p0, %p97_p13 }
  0x30   :  { %105 = shalt.err (!%p102_p1)
}
  0x31   :  { %50 = dma.vmem_to_hbm [thread:$0]  %s48_s23, 256, %s156_s2, [#allocation6]  }
  0x32   :  { %108 = dma.done.wait [#allocation6], 256  }
  0x33   :  { %109 = vsyncadd [#allocation6], 4294967040 }
  0x34   :  { %54 = vsyncpa [#allocation5], 1 }
  0x35   :  { %55 = vsyncpa [#allocation6], 1 }

</bundles_post_ra>
